<compile_context>
chip_gen: v5e
topology: v5e:2x2
jax: 0.10.0
libtpu: 0.0.40
codegen_flags: <defaults>
</compile_context>

<pallas_src>
import jax
import jax.numpy as jnp
from jax import lax
from jax.experimental import pallas as pl
from jax.experimental.pallas import tpu as pltpu

BN_EPS = 1e-5


def _make_kernel(H, W, identical):
    def kernel(x_ref, w1_ref, b1_ref, w2_ref, b2_ref, w3_ref, b3_ref, *rest):
        if identical:
            o_ref, pad_ref, col_ref = rest
        else:
            ws_ref, bs_ref, o_ref, pad_ref, col_ref = rest

        Cin = x_ref.shape[-1]
        Cm = w1_ref.shape[1]
        Cout = w3_ref.shape[1]
        cdt = pad_ref.dtype

        # Zero only the 1-wide border of the padded scratch; the interior is
        # fully overwritten below every step. Cheap, and safe regardless of how
        # the "parallel" grid axis is sharded across TensorCores.
        pad_ref[0:1, :, :] = jnp.zeros((1, W + 2, Cm), cdt)
        pad_ref[H + 1:H + 2, :, :] = jnp.zeros((1, W + 2, Cm), cdt)
        pad_ref[:, 0:1, :] = jnp.zeros((H + 2, 1, Cm), cdt)
        pad_ref[:, W + 1:W + 2, :] = jnp.zeros((H + 2, 1, Cm), cdt)

        xf = x_ref[0].reshape(H * W, Cin)                    # (H*W, Cin)

        # ---- conv1 (1x1, BN1 scale folded into w1) + bias + relu -------------
        t1 = jnp.dot(xf, w1_ref[...], preferred_element_type=jnp.float32)
        t1 = jnp.maximum(t1 + b1_ref[...], 0.0)              # (H*W, Cm) f32
        pad_ref[1:H + 1, 1:W + 1, :] = t1.reshape(H, W, Cm).astype(cdt)

        # ---- conv2 (3x3, pad=1) as a single im2col matmul, K = 9*Cm ----------
        for k in range(9):
            dy, dx = divmod(k, 3)
            col_ref[:, :, k * Cm:(k + 1) * Cm] = pad_ref[dy:dy + H, dx:dx + W, :]
        t2 = jnp.dot(col_ref[...].reshape(H * W, 9 * Cm), w2_ref[...],
                     preferred_element_type=jnp.float32)
        t2 = jnp.maximum(t2 + b2_ref[...], 0.0).astype(cdt)  # (H*W, Cm)

        # ---- conv3 (1x1, BN3 scale folded into w3) + bias --------------------
        res = jnp.dot(t2, w3_ref[...], preferred_element_type=jnp.float32)
        res = res + b3_ref[...]                               # (H*W, Cout) f32

        # ---- shortcut (specialized at trace time) ----------------------------
        if identical:
            res = res + xf.astype(jnp.float32)
        else:
            sc = jnp.dot(xf, ws_ref[...], preferred_element_type=jnp.float32)
            res = res + (sc + bs_ref[...])

        # ---- residual relu + single store ------------------------------------
        o_ref[0] = jnp.maximum(res, 0.0).reshape(H, W, Cout).astype(o_ref.dtype)

    return kernel


def _fold_bn(gamma, beta, mean, var):
    s = gamma / jnp.sqrt(var + BN_EPS)
    return s, beta - mean * s


def bottleneck_forward_nhwc(x_nhwc, p, *, identical, stride,
                            compute_dtype=jnp.float32):
    """Fused Bottleneck forward on NHWC input; returns NHWC output."""
    if identical:
        assert stride == 1, "identical shortcut requires stride == 1"
    # A 1x1 conv with stride s == the same 1x1 conv on the subsampled input
    # (this module puts the stride on conv1 / sideway, both 1x1).
    if stride != 1:
        x_nhwc = x_nhwc[:, ::stride, ::stride, :]
    N, H, W, Cin = x_nhwc.shape
    Cm = p['w1_oihw'].shape[0]
    Cout = p['w3_oihw'].shape[0]

    cdt = jnp.dtype(compute_dtype)
    row = lambda v: v.reshape(1, -1).astype(jnp.float32)

    # Fold BN (eval mode) scales into the conv weights; only biases stay.
    s1, b1 = _fold_bn(*p['bn1'])
    s2, b2 = _fold_bn(*p['bn2'])
    s3, b3 = _fold_bn(*p['bn3'])
    w1 = (p['w1_oihw'][:, :, 0, 0].T * s1[None, :]).astype(cdt)            # (Cin, Cm)
    w2 = (jnp.transpose(p['w2_oihw'], (2, 3, 1, 0))                        # (3,3,Cm,Cm)
          * s2[None, None, None, :]).reshape(9 * Cm, Cm).astype(cdt)       # (9*Cm, Cm)
    w3 = (p['w3_oihw'][:, :, 0, 0].T * s3[None, :]).astype(cdt)            # (Cm, Cout)

    x = x_nhwc.astype(cdt)
    args = [x, w1, row(b1), w2, row(b2), w3, row(b3)]

    full = lambda shape: pl.BlockSpec(shape, lambda n, _s=shape: (0,) * len(_s))
    in_specs = [
        pl.BlockSpec((1, H, W, Cin), lambda n: (n, 0, 0, 0)),
        full((Cin, Cm)), full((1, Cm)),
        full((9 * Cm, Cm)), full((1, Cm)),
        full((Cm, Cout)), full((1, Cout)),
    ]

    if not identical:
        ss, bs = _fold_bn(*p['bns'])
        ws = (p['ws_oihw'][:, :, 0, 0].T * ss[None, :]).astype(cdt)        # (Cin, Cout)
        args += [ws, row(bs)]
        in_specs += [full((Cin, Cout)), full((1, Cout))]
    else:
        assert Cin == Cout, "identical bottleneck requires in_channels == 4*channels"

    # Explicit scoped-VMEM budget from the per-step working set (with slack).
    bpe = cdt.itemsize
    n_w = Cin * Cm + 9 * Cm * Cm + Cm * Cout + (0 if identical else Cin * Cout)
    n_b = 2 * Cm + Cout + (0 if identical else Cout)
    working = (2 * H * W * (Cin + Cout) * bpe          # in/out blocks, double-buffered
               + 2 * n_w * bpe + 2 * n_b * 4           # weights / biases
               + (H + 2) * (W + 2) * Cm * bpe          # zero-pad scratch
               + H * W * 9 * Cm * bpe                  # im2col scratch
               + 6 * H * W * max(Cm, Cout) * 4)        # f32 temporaries headroom
    vmem_limit = min(max(int(1.5 * working) + (4 << 20), 32 << 20), 96 << 20)

    out = pl.pallas_call(
        _make_kernel(H, W, identical),
        out_shape=jax.ShapeDtypeStruct((N, H, W, Cout), cdt),
        grid_spec=pltpu.PrefetchScalarGridSpec(
            num_scalar_prefetch=0,
            grid=(N,),
            in_specs=in_specs,
            out_specs=pl.BlockSpec((1, H, W, Cout), lambda n: (n, 0, 0, 0)),
            scratch_shapes=[
                pltpu.VMEM((H + 2, W + 2, Cm), cdt),    # zero-padded conv1 output
                pltpu.VMEM((H, W, 9 * Cm), cdt),        # im2col buffer
            ],
        ),
        compiler_params=pltpu.CompilerParams(
            dimension_semantics=("parallel",),
            vmem_limit_bytes=vmem_limit,
        ),
    )(*args)
    return out


def bottleneck_forward(x_nchw, p, *, identical, stride, compute_dtype=jnp.float32):
    """NCHW wrapper matching the PyTorch module's layout."""
    x = jnp.transpose(x_nchw, (0, 2, 3, 1))
    y = bottleneck_forward_nhwc(x, p, identical=identical, stride=stride,
                                compute_dtype=compute_dtype)
    return jnp.transpose(y, (0, 3, 1, 2))


# ----------------------------- parameter init --------------------------------
def init_params(key, in_channels, channels, identical):
    cm, cout = channels, 4 * channels
    ks = jax.random.split(key, 8)

    def bn_params(k, c):
        k1, k2, k3, k4 = jax.random.split(k, 4)
        gamma = jax.random.uniform(k1, (c,), jnp.float32, 0.5, 1.5)
        beta = 0.1 * jax.random.normal(k2, (c,), jnp.float32)
        mean = 0.1 * jax.random.normal(k3, (c,), jnp.float32)
        var = jax.random.uniform(k4, (c,), jnp.float32, 0.5, 1.5)
        return (gamma, beta, mean, var)

    p = {
        'w1_oihw': 0.1 * jax.random.normal(ks[0], (cm, in_channels, 1, 1), jnp.float32),
        'bn1': bn_params(ks[1], cm),
        'w2_oihw': 0.1 * jax.random.normal(ks[2], (cm, cm, 3, 3), jnp.float32),
        'bn2': bn_params(ks[3], cm),
        'w3_oihw': 0.1 * jax.random.normal(ks[4], (cout, cm, 1, 1), jnp.float32),
        'bn3': bn_params(ks[5], cout),
    }
    if not identical:
        p['ws_oihw'] = 0.1 * jax.random.normal(ks[6], (cout, in_channels, 1, 1), jnp.float32)
        p['bns'] = bn_params(ks[7], cout)
    return p


# ----------------------- pure-JAX reference (eval-mode BN) -------------------
def ref_forward(x_nchw, p, *, identical, stride):
    def conv(x, w, stride=1, pad=0):
        return lax.conv_general_dilated(
            x, w, (stride, stride), [(pad, pad), (pad, pad)],
            dimension_numbers=('NCHW', 'OIHW', 'NCHW'))

    def bn(x, bnp):
        gamma, beta, mean, var = bnp
        s = gamma / jnp.sqrt(var + BN_EPS)
        return x * s[None, :, None, None] + (beta - mean * s)[None, :, None, None]

    relu = lambda v: jnp.maximum(v, 0.0)
    res = relu(bn(conv(x_nchw, p['w1_oihw'], stride=stride), p['bn1']))
    res = relu(bn(conv(res, p['w2_oihw'], pad=1), p['bn2']))
    res = bn(conv(res, p['w3_oihw']), p['bn3'])
    shortcut = x_nchw if identical else bn(conv(x_nchw, p['ws_oihw'], stride=stride), p['bns'])
    return relu(shortcut + res)


if __name__ == "__main__":
    key = jax.random.PRNGKey(0)
    k_x, k_x2, k_p1, k_p2 = jax.random.split(key, 4)

    # Case 1: downsampling bottleneck (identical=False, stride=2, sideway path).
    in_c, ch = 8, 4
    x = jax.random.normal(k_x, (2, in_c, 16, 16), jnp.float32)
    p1 = init_params(k_p1, in_c, ch, identical=False)
    y1 = jax.block_until_ready(bottleneck_forward(x, p1, identical=False, stride=2))
    r1 = ref_forward(x, p1, identical=False, stride=2)
    assert y1.shape == (2, 4 * ch, 8, 8), y1.shape
    assert jnp.allclose(y1, r1, atol=1e-4, rtol=1e-4), float(jnp.max(jnp.abs(y1 - r1)))

    # Case 2: identity bottleneck (identical=True, stride=1, in_channels == 4*channels).
    in_c2 = 4 * ch
    x2 = jax.random.normal(k_x2, (2, in_c2, 16, 16), jnp.float32)
    p2 = init_params(k_p2, in_c2, ch, identical=True)
    y2 = jax.block_until_ready(bottleneck_forward(x2, p2, identical=True, stride=1))
    r2 = ref_forward(x2, p2, identical=True, stride=1)
    assert y2.shape == (2, 4 * ch, 16, 16), y2.shape
    assert jnp.allclose(y2, r2, atol=1e-4, rtol=1e-4), float(jnp.max(jnp.abs(y2 - r2)))

    # Case 3: bf16 compute path (bf16 MXU inputs, f32 accumulation) — loose tol vs f32 ref.
    y3 = jax.block_until_ready(
        bottleneck_forward(x2, p2, identical=True, stride=1,
                           compute_dtype=jnp.bfloat16))
    assert y3.shape == (2, 4 * ch, 16, 16), y3.shape
    d3 = jnp.max(jnp.abs(y3.astype(jnp.float32) - r2))
    assert jnp.allclose(y3.astype(jnp.float32), r2, atol=1e-1, rtol=1e-1), float(d3)

    print("KERNEL_OK")
</pallas_src>

<mosaic_0001>
module attributes {stable_mosaic.version = 11 : i64} {
  func.func @kernel(%arg0: i32, %arg1: memref<1x8x8x8xf32, #tpu.memory_space<vmem>>, %arg2: memref<8x4xf32, #tpu.memory_space<vmem>>, %arg3: memref<1x4xf32, #tpu.memory_space<vmem>>, %arg4: memref<36x4xf32, #tpu.memory_space<vmem>>, %arg5: memref<1x4xf32, #tpu.memory_space<vmem>>, %arg6: memref<4x16xf32, #tpu.memory_space<vmem>>, %arg7: memref<1x16xf32, #tpu.memory_space<vmem>>, %arg8: memref<8x16xf32, #tpu.memory_space<vmem>>, %arg9: memref<1x16xf32, #tpu.memory_space<vmem>>, %arg10: memref<1x8x8x16xf32, #tpu.memory_space<vmem>>, %arg11: memref<10x10x4xf32, #tpu.memory_space<vmem>>, %arg12: memref<8x8x36xf32, #tpu.memory_space<vmem>>) attributes {dimension_semantics = [#tpu.dimension_semantics<parallel>], iteration_bounds = array<i64: 2>, scalar_prefetch = 0 : i64, scratch_operands = 2 : i64, tpu.core_type = #tpu.core_type<tc>, window_params = [{transform_indices = @transform_0, window_bounds = array<i64: 1, 8, 8, 8>}, {pipeline_mode = #tpu.pipeline_mode<synchronous>, transform_indices = @transform_1, window_bounds = array<i64: 8, 4>}, {pipeline_mode = #tpu.pipeline_mode<synchronous>, transform_indices = @transform_2, window_bounds = array<i64: 1, 4>}, {pipeline_mode = #tpu.pipeline_mode<synchronous>, transform_indices = @transform_3, window_bounds = array<i64: 36, 4>}, {pipeline_mode = #tpu.pipeline_mode<synchronous>, transform_indices = @transform_4, window_bounds = array<i64: 1, 4>}, {pipeline_mode = #tpu.pipeline_mode<synchronous>, transform_indices = @transform_5, window_bounds = array<i64: 4, 16>}, {pipeline_mode = #tpu.pipeline_mode<synchronous>, transform_indices = @transform_6, window_bounds = array<i64: 1, 16>}, {pipeline_mode = #tpu.pipeline_mode<synchronous>, transform_indices = @transform_7, window_bounds = array<i64: 8, 16>}, {pipeline_mode = #tpu.pipeline_mode<synchronous>, transform_indices = @transform_8, window_bounds = array<i64: 1, 16>}, {transform_indices = @transform_9, window_bounds = array<i64: 1, 8, 8, 16>}]} {
    %cst = arith.constant 0.000000e+00 : f32
    %0 = vector.broadcast %cst : f32 to vector<1x10x4xf32>
    %c0 = arith.constant 0 : index
    %c0_0 = arith.constant 0 : index
    %c0_1 = arith.constant 0 : index
    %1 = vector.load %arg11[%c0, %c0_0, %c0_1] : memref<10x10x4xf32, #tpu.memory_space<vmem>>, vector<1x10x4xf32>
    tpu.vector_store %arg11[%c0, %c0_0, %c0_1], %0 {strides = array<i32>} : memref<10x10x4xf32, #tpu.memory_space<vmem>>, vector<1x10x4xf32>,
    %cst_2 = arith.constant 0.000000e+00 : f32
    %2 = vector.broadcast %cst_2 : f32 to vector<1x10x4xf32>
    %c9 = arith.constant 9 : index
    %c0_3 = arith.constant 0 : index
    %c0_4 = arith.constant 0 : index
    %3 = vector.load %arg11[%c9, %c0_3, %c0_4] : memref<10x10x4xf32, #tpu.memory_space<vmem>>, vector<1x10x4xf32>
    tpu.vector_store %arg11[%c9, %c0_3, %c0_4], %2 {strides = array<i32>} : memref<10x10x4xf32, #tpu.memory_space<vmem>>, vector<1x10x4xf32>,
    %cst_5 = arith.constant 0.000000e+00 : f32
    %4 = vector.broadcast %cst_5 : f32 to vector<10x1x4xf32>
    %c0_6 = arith.constant 0 : index
    %c0_7 = arith.constant 0 : index
    %c0_8 = arith.constant 0 : index
    %5 = vector.load %arg11[%c0_6, %c0_7, %c0_8] : memref<10x10x4xf32, #tpu.memory_space<vmem>>, vector<10x1x4xf32>
    tpu.vector_store %arg11[%c0_6, %c0_7, %c0_8], %4 {strides = array<i32>} : memref<10x10x4xf32, #tpu.memory_space<vmem>>, vector<10x1x4xf32>,
    %cst_9 = arith.constant 0.000000e+00 : f32
    %6 = vector.broadcast %cst_9 : f32 to vector<10x1x4xf32>
    %c0_10 = arith.constant 0 : index
    %c9_11 = arith.constant 9 : index
    %c0_12 = arith.constant 0 : index
    %7 = vector.load %arg11[%c0_10, %c9_11, %c0_12] : memref<10x10x4xf32, #tpu.memory_space<vmem>>, vector<10x1x4xf32>
    tpu.vector_store %arg11[%c0_10, %c9_11, %c0_12], %6 {strides = array<i32>} : memref<10x10x4xf32, #tpu.memory_space<vmem>>, vector<10x1x4xf32>,
    %c0_13 = arith.constant 0 : index
    %c0_14 = arith.constant 0 : index
    %c0_15 = arith.constant 0 : index
    %c0_16 = arith.constant 0 : index
    %8 = vector.load %arg1[%c0_13, %c0_14, %c0_15, %c0_16] : memref<1x8x8x8xf32, #tpu.memory_space<vmem>>, vector<1x8x8x8xf32>
    %9 = vector.shape_cast %8 : vector<1x8x8x8xf32> to vector<8x8x8xf32>
    %10 = vector.shape_cast %9 : vector<8x8x8xf32> to vector<64x8xf32>
    %c0_17 = arith.constant 0 : index
    %c0_18 = arith.constant 0 : index
    %11 = vector.load %arg2[%c0_17, %c0_18] : memref<8x4xf32, #tpu.memory_space<vmem>>, vector<8x4xf32>
    %cst_19 = arith.constant dense<0.000000e+00> : vector<64x4xf32>
    %12 = tpu.matmul %10, %11, %cst_19 {dimension_numbers = #tpu.dot_dimension_numbers<[1], [0], [0], [1], [0, 0, 1, 1], [], []>} : vector<64x8xf32>, vector<8x4xf32>, vector<64x4xf32> -> vector<64x4xf32>
    %c0_20 = arith.constant 0 : index
    %c0_21 = arith.constant 0 : index
    %13 = vector.load %arg3[%c0_20, %c0_21] : memref<1x4xf32, #tpu.memory_space<vmem>>, vector<1x4xf32>
    %14 = vector.broadcast %13 : vector<1x4xf32> to vector<64x4xf32>
    %15 = arith.addf %12, %14 : vector<64x4xf32>
    %cst_22 = arith.constant 0.000000e+00 : f32
    %16 = vector.broadcast %cst_22 : f32 to vector<64x4xf32>
    %17 = arith.maximumf %15, %16 : vector<64x4xf32>
    %18 = vector.shape_cast %17 : vector<64x4xf32> to vector<8x8x4xf32>
    %c1 = arith.constant 1 : index
    %c1_23 = arith.constant 1 : index
    %c0_24 = arith.constant 0 : index
    %19 = vector.load %arg11[%c1, %c1_23, %c0_24] : memref<10x10x4xf32, #tpu.memory_space<vmem>>, vector<8x8x4xf32>
    tpu.vector_store %arg11[%c1, %c1_23, %c0_24], %18 {strides = array<i32>} : memref<10x10x4xf32, #tpu.memory_space<vmem>>, vector<8x8x4xf32>,
    %c0_25 = arith.constant 0 : index
    %c0_26 = arith.constant 0 : index
    %c0_27 = arith.constant 0 : index
    %20 = vector.load %arg11[%c0_25, %c0_26, %c0_27] : memref<10x10x4xf32, #tpu.memory_space<vmem>>, vector<8x8x4xf32>
    %c0_28 = arith.constant 0 : index
    %c0_29 = arith.constant 0 : index
    %c0_30 = arith.constant 0 : index
    %21 = vector.load %arg12[%c0_28, %c0_29, %c0_30] : memref<8x8x36xf32, #tpu.memory_space<vmem>>, vector<8x8x4xf32>
    tpu.vector_store %arg12[%c0_28, %c0_29, %c0_30], %20 {strides = array<i32>} : memref<8x8x36xf32, #tpu.memory_space<vmem>>, vector<8x8x4xf32>,
    %c0_31 = arith.constant 0 : index
    %c1_32 = arith.constant 1 : index
    %c0_33 = arith.constant 0 : index
    %22 = vector.load %arg11[%c0_31, %c1_32, %c0_33] : memref<10x10x4xf32, #tpu.memory_space<vmem>>, vector<8x8x4xf32>
    %c0_34 = arith.constant 0 : index
    %c0_35 = arith.constant 0 : index
    %c4 = arith.constant 4 : index
    %23 = vector.load %arg12[%c0_34, %c0_35, %c4] : memref<8x8x36xf32, #tpu.memory_space<vmem>>, vector<8x8x4xf32>
    tpu.vector_store %arg12[%c0_34, %c0_35, %c4], %22 {strides = array<i32>} : memref<8x8x36xf32, #tpu.memory_space<vmem>>, vector<8x8x4xf32>,
    %c0_36 = arith.constant 0 : index
    %c2 = arith.constant 2 : index
    %c0_37 = arith.constant 0 : index
    %24 = vector.load %arg11[%c0_36, %c2, %c0_37] : memref<10x10x4xf32, #tpu.memory_space<vmem>>, vector<8x8x4xf32>
    %c0_38 = arith.constant 0 : index
    %c0_39 = arith.constant 0 : index
    %c8 = arith.constant 8 : index
    %25 = vector.load %arg12[%c0_38, %c0_39, %c8] : memref<8x8x36xf32, #tpu.memory_space<vmem>>, vector<8x8x4xf32>
    tpu.vector_store %arg12[%c0_38, %c0_39, %c8], %24 {strides = array<i32>} : memref<8x8x36xf32, #tpu.memory_space<vmem>>, vector<8x8x4xf32>,
    %c1_40 = arith.constant 1 : index
    %c0_41 = arith.constant 0 : index
    %c0_42 = arith.constant 0 : index
    %26 = vector.load %arg11[%c1_40, %c0_41, %c0_42] : memref<10x10x4xf32, #tpu.memory_space<vmem>>, vector<8x8x4xf32>
    %c0_43 = arith.constant 0 : index
    %c0_44 = arith.constant 0 : index
    %c12 = arith.constant 12 : index
    %27 = vector.load %arg12[%c0_43, %c0_44, %c12] : memref<8x8x36xf32, #tpu.memory_space<vmem>>, vector<8x8x4xf32>
    tpu.vector_store %arg12[%c0_43, %c0_44, %c12], %26 {strides = array<i32>} : memref<8x8x36xf32, #tpu.memory_space<vmem>>, vector<8x8x4xf32>,
    %c1_45 = arith.constant 1 : index
    %c1_46 = arith.constant 1 : index
    %c0_47 = arith.constant 0 : index
    %28 = vector.load %arg11[%c1_45, %c1_46, %c0_47] : memref<10x10x4xf32, #tpu.memory_space<vmem>>, vector<8x8x4xf32>
    %c0_48 = arith.constant 0 : index
    %c0_49 = arith.constant 0 : index
    %c16 = arith.constant 16 : index
    %29 = vector.load %arg12[%c0_48, %c0_49, %c16] : memref<8x8x36xf32, #tpu.memory_space<vmem>>, vector<8x8x4xf32>
    tpu.vector_store %arg12[%c0_48, %c0_49, %c16], %28 {strides = array<i32>} : memref<8x8x36xf32, #tpu.memory_space<vmem>>, vector<8x8x4xf32>,
    %c1_50 = arith.constant 1 : index
    %c2_51 = arith.constant 2 : index
    %c0_52 = arith.constant 0 : index
    %30 = vector.load %arg11[%c1_50, %c2_51, %c0_52] : memref<10x10x4xf32, #tpu.memory_space<vmem>>, vector<8x8x4xf32>
    %c0_53 = arith.constant 0 : index
    %c0_54 = arith.constant 0 : index
    %c20 = arith.constant 20 : index
    %31 = vector.load %arg12[%c0_53, %c0_54, %c20] : memref<8x8x36xf32, #tpu.memory_space<vmem>>, vector<8x8x4xf32>
    tpu.vector_store %arg12[%c0_53, %c0_54, %c20], %30 {strides = array<i32>} : memref<8x8x36xf32, #tpu.memory_space<vmem>>, vector<8x8x4xf32>,
    %c2_55 = arith.constant 2 : index
    %c0_56 = arith.constant 0 : index
    %c0_57 = arith.constant 0 : index
    %32 = vector.load %arg11[%c2_55, %c0_56, %c0_57] : memref<10x10x4xf32, #tpu.memory_space<vmem>>, vector<8x8x4xf32>
    %c0_58 = arith.constant 0 : index
    %c0_59 = arith.constant 0 : index
    %c24 = arith.constant 24 : index
    %33 = vector.load %arg12[%c0_58, %c0_59, %c24] : memref<8x8x36xf32, #tpu.memory_space<vmem>>, vector<8x8x4xf32>
    tpu.vector_store %arg12[%c0_58, %c0_59, %c24], %32 {strides = array<i32>} : memref<8x8x36xf32, #tpu.memory_space<vmem>>, vector<8x8x4xf32>,
    %c2_60 = arith.constant 2 : index
    %c1_61 = arith.constant 1 : index
    %c0_62 = arith.constant 0 : index
    %34 = vector.load %arg11[%c2_60, %c1_61, %c0_62] : memref<10x10x4xf32, #tpu.memory_space<vmem>>, vector<8x8x4xf32>
    %c0_63 = arith.constant 0 : index
    %c0_64 = arith.constant 0 : index
    %c28 = arith.constant 28 : index
    %35 = vector.load %arg12[%c0_63, %c0_64, %c28] : memref<8x8x36xf32, #tpu.memory_space<vmem>>, vector<8x8x4xf32>
    tpu.vector_store %arg12[%c0_63, %c0_64, %c28], %34 {strides = array<i32>} : memref<8x8x36xf32, #tpu.memory_space<vmem>>, vector<8x8x4xf32>,
    %c2_65 = arith.constant 2 : index
    %c2_66 = arith.constant 2 : index
    %c0_67 = arith.constant 0 : index
    %36 = vector.load %arg11[%c2_65, %c2_66, %c0_67] : memref<10x10x4xf32, #tpu.memory_space<vmem>>, vector<8x8x4xf32>
    %c0_68 = arith.constant 0 : index
    %c0_69 = arith.constant 0 : index
    %c32 = arith.constant 32 : index
    %37 = vector.load %arg12[%c0_68, %c0_69, %c32] : memref<8x8x36xf32, #tpu.memory_space<vmem>>, vector<8x8x4xf32>
    tpu.vector_store %arg12[%c0_68, %c0_69, %c32], %36 {strides = array<i32>} : memref<8x8x36xf32, #tpu.memory_space<vmem>>, vector<8x8x4xf32>,
    %c0_70 = arith.constant 0 : index
    %c0_71 = arith.constant 0 : index
    %c0_72 = arith.constant 0 : index
    %38 = vector.load %arg12[%c0_70, %c0_71, %c0_72] : memref<8x8x36xf32, #tpu.memory_space<vmem>>, vector<8x8x36xf32>
    %39 = vector.shape_cast %38 : vector<8x8x36xf32> to vector<64x36xf32>
    %c0_73 = arith.constant 0 : index
    %c0_74 = arith.constant 0 : index
    %40 = vector.load %arg4[%c0_73, %c0_74] : memref<36x4xf32, #tpu.memory_space<vmem>>, vector<36x4xf32>
    %cst_75 = arith.constant dense<0.000000e+00> : vector<64x4xf32>
    %41 = tpu.matmul %39, %40, %cst_75 {dimension_numbers = #tpu.dot_dimension_numbers<[1], [0], [0], [1], [0, 0, 1, 1], [], []>} : vector<64x36xf32>, vector<36x4xf32>, vector<64x4xf32> -> vector<64x4xf32>
    %c0_76 = arith.constant 0 : index
    %c0_77 = arith.constant 0 : index
    %42 = vector.load %arg5[%c0_76, %c0_77] : memref<1x4xf32, #tpu.memory_space<vmem>>, vector<1x4xf32>
    %43 = vector.broadcast %42 : vector<1x4xf32> to vector<64x4xf32>
    %44 = arith.addf %41, %43 : vector<64x4xf32>
    %cst_78 = arith.constant 0.000000e+00 : f32
    %45 = vector.broadcast %cst_78 : f32 to vector<64x4xf32>
    %46 = arith.maximumf %44, %45 : vector<64x4xf32>
    %c0_79 = arith.constant 0 : index
    %c0_80 = arith.constant 0 : index
    %47 = vector.load %arg6[%c0_79, %c0_80] : memref<4x16xf32, #tpu.memory_space<vmem>>, vector<4x16xf32>
    %cst_81 = arith.constant dense<0.000000e+00> : vector<64x16xf32>
    %48 = tpu.matmul %46, %47, %cst_81 {dimension_numbers = #tpu.dot_dimension_numbers<[1], [0], [0], [1], [0, 0, 1, 1], [], []>} : vector<64x4xf32>, vector<4x16xf32>, vector<64x16xf32> -> vector<64x16xf32>
    %c0_82 = arith.constant 0 : index
    %c0_83 = arith.constant 0 : index
    %49 = vector.load %arg7[%c0_82, %c0_83] : memref<1x16xf32, #tpu.memory_space<vmem>>, vector<1x16xf32>
    %50 = vector.broadcast %49 : vector<1x16xf32> to vector<64x16xf32>
    %51 = arith.addf %48, %50 : vector<64x16xf32>
    %c0_84 = arith.constant 0 : index
    %c0_85 = arith.constant 0 : index
    %52 = vector.load %arg8[%c0_84, %c0_85] : memref<8x16xf32, #tpu.memory_space<vmem>>, vector<8x16xf32>
    %cst_86 = arith.constant dense<0.000000e+00> : vector<64x16xf32>
    %53 = tpu.matmul %10, %52, %cst_86 {dimension_numbers = #tpu.dot_dimension_numbers<[1], [0], [0], [1], [0, 0, 1, 1], [], []>} : vector<64x8xf32>, vector<8x16xf32>, vector<64x16xf32> -> vector<64x16xf32>
    %c0_87 = arith.constant 0 : index
    %c0_88 = arith.constant 0 : index
    %54 = vector.load %arg9[%c0_87, %c0_88] : memref<1x16xf32, #tpu.memory_space<vmem>>, vector<1x16xf32>
    %55 = vector.broadcast %54 : vector<1x16xf32> to vector<64x16xf32>
    %56 = arith.addf %53, %55 : vector<64x16xf32>
    %57 = arith.addf %51, %56 : vector<64x16xf32>
    %cst_89 = arith.constant 0.000000e+00 : f32
    %58 = vector.broadcast %cst_89 : f32 to vector<64x16xf32>
    %59 = arith.maximumf %57, %58 : vector<64x16xf32>
    %60 = vector.shape_cast %59 : vector<64x16xf32> to vector<8x8x16xf32>
    %c0_90 = arith.constant 0 : index
    %c0_91 = arith.constant 0 : index
    %c0_92 = arith.constant 0 : index
    %c0_93 = arith.constant 0 : index
    %61 = vector.load %arg10[%c0_90, %c0_91, %c0_92, %c0_93] : memref<1x8x8x16xf32, #tpu.memory_space<vmem>>, vector<1x8x8x16xf32>
    %62 = vector.shape_cast %61 : vector<1x8x8x16xf32> to vector<8x8x16xf32>
    %63 = vector.shape_cast %60 : vector<8x8x16xf32> to vector<1x8x8x16xf32>
    tpu.vector_store %arg10[%c0_90, %c0_91, %c0_92, %c0_93], %63 {strides = array<i32>} : memref<1x8x8x16xf32, #tpu.memory_space<vmem>>, vector<1x8x8x16xf32>,
    return
  }
  func.func @transform_0(%arg0: i32) -> (i32, i32, i32, i32) {
    %c0_i32 = arith.constant 0 : i32
    %c0_i32_0 = arith.constant 0 : i32
    %c0_i32_1 = arith.constant 0 : i32
    %c0_i32_2 = arith.constant 0 : i32
    return %arg0, %c0_i32, %c0_i32_0, %c0_i32_1 : i32, i32, i32, i32
  }
  func.func @transform_1(%arg0: i32) -> (i32, i32) {
    %c0_i32 = arith.constant 0 : i32
    %c0_i32_0 = arith.constant 0 : i32
    %c0_i32_1 = arith.constant 0 : i32
    return %c0_i32, %c0_i32_0 : i32, i32
  }
  func.func @transform_2(%arg0: i32) -> (i32, i32) {
    %c0_i32 = arith.constant 0 : i32
    %c0_i32_0 = arith.constant 0 : i32
    %c0_i32_1 = arith.constant 0 : i32
    return %c0_i32, %c0_i32_0 : i32, i32
  }
  func.func @transform_3(%arg0: i32) -> (i32, i32) {
    %c0_i32 = arith.constant 0 : i32
    %c0_i32_0 = arith.constant 0 : i32
    %c0_i32_1 = arith.constant 0 : i32
    return %c0_i32, %c0_i32_0 : i32, i32
  }
  func.func @transform_4(%arg0: i32) -> (i32, i32) {
    %c0_i32 = arith.constant 0 : i32
    %c0_i32_0 = arith.constant 0 : i32
    %c0_i32_1 = arith.constant 0 : i32
    return %c0_i32, %c0_i32_0 : i32, i32
  }
  func.func @transform_5(%arg0: i32) -> (i32, i32) {
    %c0_i32 = arith.constant 0 : i32
    %c0_i32_0 = arith.constant 0 : i32
    %c0_i32_1 = arith.constant 0 : i32
    return %c0_i32, %c0_i32_0 : i32, i32
  }
  func.func @transform_6(%arg0: i32) -> (i32, i32) {
    %c0_i32 = arith.constant 0 : i32
    %c0_i32_0 = arith.constant 0 : i32
    %c0_i32_1 = arith.constant 0 : i32
    return %c0_i32, %c0_i32_0 : i32, i32
  }
  func.func @transform_7(%arg0: i32) -> (i32, i32) {
    %c0_i32 = arith.constant 0 : i32
    %c0_i32_0 = arith.constant 0 : i32
    %c0_i32_1 = arith.constant 0 : i32
    return %c0_i32, %c0_i32_0 : i32, i32
  }
  func.func @transform_8(%arg0: i32) -> (i32, i32) {
    %c0_i32 = arith.constant 0 : i32
    %c0_i32_0 = arith.constant 0 : i32
    %c0_i32_1 = arith.constant 0 : i32
    return %c0_i32, %c0_i32_0 : i32, i32
  }
  func.func @transform_9(%arg0: i32) -> (i32, i32, i32, i32) {
    %c0_i32 = arith.constant 0 : i32
    %c0_i32_0 = arith.constant 0 : i32
    %c0_i32_1 = arith.constant 0 : i32
    %c0_i32_2 = arith.constant 0 : i32
    return %arg0, %c0_i32, %c0_i32_0, %c0_i32_1 : i32, i32, i32, i32
  }
}

</mosaic_0001>

<bundles_post_ra>
// kernel: tpu_custom_call.1
= control target key start
LH: loop header
LB: loop body
LE: loop exit
PB: predicated region body
PF: predicated region fallthrough
CT: control target
= control target key end

     0   :  { %14 = vsyncpa [#allocation5], 0  ;;  %s1925_s0 = inlined_call_operand.hbm [shape: f32[2,8,8,8], index: 0, kind: input, shape index: {}]   ;;  %s1926_s1 = inlined_call_operand.vmem [shape: f32[8,4], index: 1, kind: input, shape index: {}]   ;;  %s1927_s2 = inlined_call_operand.vmem [shape: f32[1,4], index: 2, kind: input, shape index: {}]   ;;  %s1928_s3 = inlined_call_operand.vmem [shape: f32[36,4], index: 3, kind: input, shape index: {}]   ;;  %s1929_s4 = inlined_call_operand.vmem [shape: f32[1,4], index: 4, kind: input, shape index: {}]   ;;  %s1930_s5 = inlined_call_operand.vmem [shape: f32[4,16], index: 5, kind: input, shape index: {}]   ;;  %s1931_s6 = inlined_call_operand.vmem [shape: f32[1,16], index: 6, kind: input, shape index: {}]   ;;  %s1932_s7 = inlined_call_operand.vmem [shape: f32[8,16], index: 7, kind: input, shape index: {}]   ;;  %s1933_s8 = inlined_call_operand.vmem [shape: f32[1,16], index: 8, kind: input, shape index: {}]   ;;  %s1934_s9 = inlined_call_operand.hbm [shape: f32[2,8,8,16], index: 9, kind: output, shape index: {}]  }
   0x1   :  { %16 = vsyncpa [#allocation5 + $0x1], 0 }
   0x2   :  { %17 = vsyncpa [#allocation6], 0 }
   0x3   :  { %19 = vsyncpa [#allocation6 + $0x1], 0  ;;  %s1486_s30 = smov 0   ;;  %s1488_s10 = smov 0  }
   0x4   :  { %s1490_s11 = smov 0   ;;  %s1492_s12 = smov 0  }
   0x5 LB: > { %1943 = sst [smem:[#allocation10_spill]] %s1418_s11  ;;  %s1507_s13 = sadd.s32 4294967295, %s1422_s12   ;;  %s1422_s12 = sphi %s1492_s12, %s1955_s12   ;;  %s1418_s11 = sphi %s1490_s11, %s1957_s11   ;;  %s1414_s10 = sphi %s1488_s10, %s1959_s10   ;;  %s1410_s30 = sphi %s1486_s30, %s1958_s30  }
   0x6   : > { %s1214_s14 = sadd.s32 4294967294, %s1422_s12   ;;  %s1511_s15 = sadd.s32 1, %s1422_s12  }
   0x7   : > { %1944 = sst [smem:[#allocation11_spill]] %s1511_s15  ;;  %s32_s16 = sadd.s32 1, %s1418_s11 }
   0x8   : > { %s29_s17 = ssub.s32 %s1422_s12, %s1511_s15  ;;  %p39_p0 = scmp.ne.s32.totalorder %s1418_s11, %s1414_s10 }
   0x9   : > { %p30_p1 = scmp.eq.s32.totalorder %s29_s17, 0  ;;  %p40_p2 = scmp.eq.s32.totalorder %s1422_s12, 0 }
   0xa   : > { %p45_p3 = scmp.ne.s32.totalorder %s1414_s10, %s1410_s30  ;;  %p46_p4 = scmp.eq.s32.totalorder %s1507_s13, 0 }
   0xb   : > { %s1523_s18 = scalar_select %p30_p1, %s1418_s11, %s32_s16  }
   0xc   : > { %p1525_p5 = por %p40_p2, %p39_p0  ;;  %p1529_p6 = por %p46_p4, %p45_p3 }
   0xd   : > { %1945 = sst [smem:[#allocation12_spill]] %s1523_s18  ;;  %p237_p7 = scmp.eq.s32.totalorder %s1507_s13, 1 }
   0xe   : > { %p243_p8 = scmp.eq.s32.totalorder %s1214_s14, 1  ;;  %p1276_p10 = scmp.lt.s32.totalorder %s1422_s12, 2 }
   0xf   : > { %p1536_p11 = por %p237_p7, %p39_p0  ;;  %s287_s23 = sand.u32 1, %s1418_s11  }
  0x10   : > { %p1540_p12 = por %p243_p8, %p45_p3  ;;  %s1262_s24 = sshll.u32 %s1422_s12, 6 }
  0x11   : > { %s1217_s25 = sshll.u32 %s287_s23, 6  ;;  %s296_s28 = scalar_lea.hbm %s1925_s0, %s1262_s24 }
  0x12   : > { %s297_s29 = sshll.u32 %s296_s28, 4  ;;  %s291_s14 = scalar_lea.vmem [#allocation4], %s1217_s25  ;;  %s298_s29 = int_to_ptr.hbm [resolvable:$true] %s297_s29 }
  0x13   : > { %s299_s16 = sshll.u32 %s291_s14, 4  ;;  %p1551_p13 = pnand %p1276_p10, %p1525_p5  ;;  %s300_s16 = int_to_ptr.vmem [resolvable:$true] %s299_s16 }
  0x14   : > { %p1220_p0 = scmp.ge.s32.totalorder %s1422_s12, 1  ;;  %p307_p1 = scmp.lt.s32.totalorder %s1422_s12, 3 }
  0x15   : > { %s288_s18 = scalar_lea.sflag [#allocation5], %s287_s23  ;;  %s1326_s11 = sshra.s32 %s298_s29, 4  ;;  %s1327_s11 = int_to_ptr.hbm [resolvable:$true] %s1326_s11 }
  0x16   : > { %s1328_s15 = scalar_lea.hbm %s1327_s11, 64  ;;  %p1330_p3 = pneg %p1551_p13 }
  0x17   : > { %p1329_p2 = scmp.ne.s32.totalorder %s1327_s11, %s1328_s15  ;;  %s1333_s19 = scalar_lea.hbm %s1925_s0, 128 }
  0x18   : > { %p1334_p5 = scmp.lt.s32.totalorder %s1327_s11, %s1925_s0  ;;  %p1335_p8 = scmp.lt.s32.totalorder %s1333_s19, %s1328_s15 }
  0x19   : > { %p1331_p4 = pnand %p1330_p3, %p1329_p2 }
  0x1a   : > { %p1336_p10 = por %p1335_p8, %p1334_p5 }
  0x1b   : > { %p1332_p7 = pneg %p1331_p4 }
  0x1d   : > { %p1337_p9 = pnand %p1336_p10, %p1332_p7 }
  0x1f   : > { %1340 = shalt.err (!%p1337_p9)
}
  0x20   : > { %s1424_s23 = smov 128   ;;  %s1425_s28 = smov 8  }
  0x21   : > { %1271 = dma.hbm_to_vmem [thread:$0]  (!%p1551_p13), %s298_s29, 1024, %s300_s16, %s288_s18, %s1424_s23, %s1424_s23, %s1425_s28  }
  0x22   : > { %p308_p2 = pnand %p1220_p0, %p307_p1 }
  0x23   : > { %s1572_s14 = sand.u32 (!%p308_p2), 1, %s1414_s10  }
  0x24   : > { %311 = sbr.rel (%p308_p2) target bundleno = 740 (0x2e4), region = 56  ;;  %s1938_s11 = sshll.u32 (!%p308_p2), %s1572_s14, 6 }
  0x25   : > { %s314_s15 = scalar_lea.sflag (!%p308_p2), [#allocation5], %s1572_s14  ;;  %s1578_s24 = scalar_lea.vmem (!%p308_p2), [#allocation4], %s1938_s11 }
  0x29   : > { %1401 = dma.done.wait (%p1529_p6), %s314_s15, 1024  }
  0x2a   : > { %1403 = vsyncadd (%p1529_p6), %s314_s15, 4294966272  ;;  %vm394_vm0 = vcmask 64512   ;;  %v389_v0 = vld [vmem:[%s1926_s1] sm:$0xff]  ;;  %v1593_v2 = vld [vmem:[%s1578_s24 + $0x8] sm:$0xff]  ;;  %vm353_vm1 = vcmask 31744   ;;  %vm355_vm2 = vcmask 25600  }
  0x2b   : > { %v1588_v1 = vld [vmem:[%s1578_s24] sm:$0xff]  ;;  %434 = vmatpush.msra.mxu0 %v389_v0  ;;  %v1598_v3 = vld [vmem:[%s1578_s24 + $0x10] sm:$0xff]  ;;  %v1426_v4 = vmov 0.0   ;;  %vm360_vm3 = vcmask 24576   ;;  %v1606_v5 = vld [vmem:[%s1578_s24 + $0x18] sm:$0xff]  ;;  %s1427_s20 = smov 4  }
  0x2c   : > { %1223 = vmatmul.msk.f32.vlgmr.msra.gmra.mxu0 %vm394_vm0, %v1588_v1  ;;  %354 = vst.msk [vmem:[#allocation2] sm:$0xff] %vm353_vm1, %v1426_v4  ;;  %v1619_v7 = vld [vmem:[%s1578_s24 + $0x20] sm:$0xff]  ;;  %v1632_v8 = vld [vmem:[%s1578_s24 + $0x28] sm:$0xff]  ;;  %v1641_v9 = vld [vmem:[%s1578_s24 + $0x30] sm:$0xff]  ;;  %s1941_s16 = smov 8   ;;  %s1429_s19 = smov 20  }
  0x2d   : > { %356 = vst.msk [vmem:[#allocation2 + $0x8] sm:$0x3] %vm355_vm2, %v1426_v4  ;;  %v1647_v11 = vld [vmem:[%s1578_s24 + $0x38] sm:$0xff]  ;;  %v1654_v12 = vld [vmem:[%s1927_s2] ss:$0 sm:$0xff]  ;;  %s1939_s26 = smov 12  }
  0x2e   : > { %361 = vst.msk [vmem:[#allocation2] sm:$0x1] %vm360_vm3, %v1426_v4  ;;  %s1431_s27 = smov 16   ;;  %s1432_s23 = smov 28   ;;  %vm533_vm4 = vcmask 64544   ;;  %vm582_vm5 = vcmask 97344  }
  0x2f   : > { %358 = vst.msk [vmem:[#allocation2 + $0x90] sm:$0xff] %vm353_vm1, %v1426_v4  ;;  %s1433_s28 = smov 24   ;;  %s1434_s15 = smov 32   ;;  %v898_v59 = vld [vmem:[%s1928_s3 + $0x20] sm:$0xf]  ;;  %vm928_vm6 = vcmask 1043456  }
  0x30   : > { %359 = vst.msk [vmem:[#allocation2 + $0x98] sm:$0x3] %vm355_vm2, %v1426_v4  ;;  %1231 = vmatpush.msk.msra.mxu1 %vm928_vm6, %v898_v59  ;;  %v897_v61 = vld [vmem:[%s1928_s3 + $0x18] sm:$0xff]  ;;  %v896_v62 = vld [vmem:[%s1928_s3 + $0x10] sm:$0xff]  ;;  %v895_v63 = vld [vmem:[%s1928_s3 + $0x8] sm:$0xff]  ;;  %vm631_vm7 = vcmask 130144  }
  0x31   : > { %362 = vst.msk [vmem:[#allocation2 + $0x10] sm:$0x1] %vm360_vm3, %v1426_v4  ;;  %s1951_s11 = smov 8   ;;  %vm680_vm8 = vcmask 162944   ;;  %vm729_vm9 = vcmask 195744   ;;  %vm779_vm10 = vcmask 228544  }
  0x32   : > { %363 = vst.msk [vmem:[#allocation2 + $0x20] sm:$0x1] %vm360_vm3, %v1426_v4  ;;  %944 = vmatpush.msra.mxu1 %v897_v61  ;;  %vm828_vm11 = vcmask 261344   ;;  %vm877_vm12 = vcmask 294144   ;;  %vm903_vm13 = vcmask 293888   ;;  %vm1116_vm14 = vcmask 130048  }
  0x33   : > { %364 = vst.msk [vmem:[#allocation2 + $0x30] sm:$0x1] %vm360_vm3, %v1426_v4  ;;  %s1953_s24 = sshll.u32 %s1572_s14, 6  ;;  %s1376_s25 = scalar_lea.hbm %s1934_s9, 128 }
  0x34   : > { %1224 = vmatmul.msk.f32.gmra.mxu0 %vm394_vm0, %v1593_v2  ;;  %v493_v6 = vld [vmem:[#allocation2 + $0x1] sm:$0xff]  ;;  %365 = vst.msk [vmem:[#allocation2 + $0x40] sm:$0x1] %vm360_vm3, %v1426_v4  ;;  %945 = vmatpush.msra.mxu1 %v896_v62  ;;  %s1871_s18 = scalar_lea.vmem [#allocation7], %s1953_s24 }
  0x35   : > { %509 = vrot.lane.b32.xlu0 %v493_v6, %s1427_s20  ;;  %366 = vst.msk [vmem:[#allocation2 + $0x50] sm:$0x1] %vm360_vm3, %v1426_v4  ;;  %v477_v46 = vld [vmem:[#allocation2] sm:$0xff] }
  0x36   : > { %367 = vst.msk [vmem:[#allocation2 + $0x60] sm:$0x1] %vm360_vm3, %v1426_v4  ;;  %946 = vmatpush.msra.mxu1 %v895_v63 }
  0x37   : > { %368 = vst.msk [vmem:[#allocation2 + $0x70] sm:$0x1] %vm360_vm3, %v1426_v4 }
  0x38   : > { %369 = vst.msk [vmem:[#allocation2 + $0x80] sm:$0x1] %vm360_vm3, %v1426_v4 }
  0x39   : > { %371 = vst.msk [vmem:[#allocation2 + $0x9] sm:$0x1] %vm360_vm3, %v1426_v4 }
  0x3a   : > { %372 = vst.msk [vmem:[#allocation2 + $0x19] sm:$0x1] %vm360_vm3, %v1426_v4 }
  0x3b   : > { %373 = vst.msk [vmem:[#allocation2 + $0x29] sm:$0x1] %vm360_vm3, %v1426_v4 }
  0x3c   : > { %1225 = vmatmul.msk.f32.gmra.mxu0 %vm394_vm0, %v1598_v3  ;;  %374 = vst.msk [vmem:[#allocation2 + $0x39] sm:$0x1] %vm360_vm3, %v1426_v4 }
  0x3d   : > { %375 = vst.msk [vmem:[#allocation2 + $0x49] sm:$0x1] %vm360_vm3, %v1426_v4 }
  0x3e   : > { %376 = vst.msk [vmem:[#allocation2 + $0x59] sm:$0x1] %vm360_vm3, %v1426_v4 }
  0x3f   : > { %377 = vst.msk [vmem:[#allocation2 + $0x69] sm:$0x1] %vm360_vm3, %v1426_v4 }
  0x40   : > { %378 = vst.msk [vmem:[#allocation2 + $0x79] sm:$0x1] %vm360_vm3, %v1426_v4  ;;  %v542_v10 = vld [vmem:[#allocation2 + $0x2] sm:$0xff] }
  0x41   : > { %379 = vst.msk [vmem:[#allocation2 + $0x89] sm:$0x1] %vm360_vm3, %v1426_v4  ;;  %558 = vrot.lane.b32.xlu0 %v542_v10, %s1941_s16 }
  0x42   : > { %370 = vst.msk [vmem:[#allocation2 + $0x90] sm:$0x1] %vm360_vm3, %v1426_v4 }
  0x43   : > { %380 = vst.msk [vmem:[#allocation2 + $0x99] sm:$0x1] %vm360_vm3, %v1426_v4  ;;  %v894_v4 = vld [vmem:[%s1928_s3] sm:$0xff] }
  0x44   : > { %1226 = vmatmul.msk.f32.gmra.mxu0 %vm394_vm0, %v1606_v5  ;;  %485 = vst.msk [vmem:[#allocation3] sm:$0xff] %vm353_vm1, %v477_v46  ;;  %947 = vmatpush.msra.mxu1 %v894_v4 }
  0x4c   : > { %1227 = vmatmul.msk.f32.gmra.mxu0 %vm394_vm0, %v1619_v7 }
  0x54   : > { %1228 = vmatmul.msk.f32.gmra.mxu0 %vm394_vm0, %v1632_v8 }
  0x5c   : > { %1229 = vmatmul.msk.f32.gmra.mxu0 %vm394_vm0, %v1641_v9 }
  0x64   : > { %1230 = vmatmul.msk.f32.gmra.mxu0 %vm394_vm0, %v1647_v11 }
  0xa7   : > { %v510_v45 = vpop.permute.xlu0 %509 }
  0xa8   : > { %534 = vst.msk [vmem:[#allocation3] sm:$0xff] %vm533_vm4, %v510_v45 }
  0xa9   : > { %v436_v13 = vpop.f32.mrf.mxu0 }
  0xaa   : > { %v437_v14 = vadd.f32 %v1654_v12, %v436_v13 }
  0xac   : > { %v460_v15 = vmax.f32 %v437_v14, 0.0 }
  0xae   : > { %469 = vst.msk [vmem:[#allocation2 + $0x11] sm:$0xff] %vm353_vm1, %v460_v15 }
  0xb1   : > { %v439_v16 = vpop.f32.mrf.mxu0 }
  0xb2   : > { %v440_v17 = vadd.f32 %v1654_v12, %v439_v16 }
  0xb3   : > { %v559_v51 = vpop.permute.xlu0 %558 }
  0xb4   : > { %v461_v18 = vmax.f32 %v440_v17, 0.0  ;;  %583 = vst.msk [vmem:[#allocation3] sm:$0xff] %vm582_vm5, %v559_v51 }
  0xb5   : > { %v689_v19 = vld [vmem:[#allocation2 + $0x12] sm:$0xff] }
  0xb6   : > { %v591_v20 = vld [vmem:[#allocation2 + $0x10] sm:$0xff]  ;;  %470 = vst.msk [vmem:[#allocation2 + $0x21] sm:$0xff] %vm353_vm1, %v461_v18  ;;  %705 = vrot.lane.b32.xlu2 %v689_v19, %s1429_s19  ;;  %560 = vrot.lane.b32.xlu0 %v689_v19, %s1941_s16 }
  0xb7   : > { %607 = vrot.lane.b32.xlu1 %v591_v20, %s1939_s26  ;;  %486 = vst.msk [vmem:[#allocation3 + $0x8] sm:$0xff] %vm353_vm1, %v591_v20  ;;  %v494_v24 = vld [vmem:[#allocation2 + $0x11] sm:$0xff] }
  0xb9   : > { %v442_v21 = vpop.f32.mrf.mxu0 }
  0xba   : > { %v443_v22 = vadd.f32 %v1654_v12, %v442_v21 }
  0xbc   : > { %v462_v23 = vmax.f32 %v443_v22, 0.0 }
  0xbd   : > { %v788_v25 = vld [vmem:[#allocation2 + $0x21] sm:$0xff] }
  0xbe   : > { %v739_v26 = vld [vmem:[#allocation2 + $0x20] sm:$0xff]  ;;  %511 = vrot.lane.b32.xlu2 %v494_v24, %s1427_s20  ;;  %471 = vst.msk [vmem:[#allocation2 + $0x31] sm:$0xff] %vm353_vm1, %v462_v23  ;;  %804 = vrot.lane.b32.xlu0 %v788_v25, %s1432_s23 }
  0xbf   : > { %656 = vrot.lane.b32.xlu1 %v494_v24, %s1431_s27  ;;  %487 = vst.msk [vmem:[#allocation3 + $0x10] sm:$0xff] %vm353_vm1, %v739_v26  ;;  %v837_v29 = vld [vmem:[#allocation2 + $0x22] sm:$0xff] }
  0xc1   : > { %v445_v27 = vpop.f32.mrf.mxu0 }
  0xc2   : > { %v446_v28 = vadd.f32 %v1654_v12, %v445_v27 }
  0xc4   : > { %v463_v30 = vmax.f32 %v446_v28, 0.0 }
  0xc5   : > { %v593_v31 = vld [vmem:[#allocation2 + $0x30] sm:$0xff] }
  0xc6   : > { %755 = vrot.lane.b32.xlu2 %v739_v26, %s1433_s28  ;;  %472 = vst.msk [vmem:[#allocation2 + $0x41] sm:$0xff] %vm353_vm1, %v463_v30  ;;  %707 = vrot.lane.b32.xlu0 %v837_v29, %s1429_s19  ;;  %v838_v32 = vld [vmem:[#allocation2 + $0x32] sm:$0xff] }
  0xc7   : > { %853 = vrot.lane.b32.xlu1 %v837_v29, %s1434_s15  ;;  %488 = vst.msk [vmem:[#allocation3 + $0x18] sm:$0xff] %vm353_vm1, %v593_v31  ;;  %v789_v37 = vld [vmem:[#allocation2 + $0x31] sm:$0xff] }
  0xc9   : > { %v448_v34 = vpop.f32.mrf.mxu0 }
  0xca   : > { %v449_v35 = vadd.f32 %v1654_v12, %v448_v34 }
  0xcc   : > { %v464_v36 = vmax.f32 %v449_v35, 0.0 }
  0xcd   : > { %v741_v33 = vld [vmem:[#allocation2 + $0x40] sm:$0xff] }
  0xce   : > { %658 = vrot.lane.b32.xlu2 %v788_v25, %s1431_s27  ;;  %489 = vst.msk [vmem:[#allocation3 + $0x20] sm:$0xff] %vm353_vm1, %v741_v33  ;;  %855 = vrot.lane.b32.xlu0 %v838_v32, %s1434_s15  ;;  %v839_v42 = vld [vmem:[#allocation2 + $0x42] sm:$0xff] }
  0xcf   : > { %609 = vrot.lane.b32.xlu1 %v739_v26, %s1939_s26  ;;  %473 = vst.msk [vmem:[#allocation2 + $0x51] sm:$0xff] %vm353_vm1, %v464_v36  ;;  %v643_v43 = vld [vmem:[#allocation2 + $0x41] sm:$0xff]  ;;  %v746_v36 = vld [vmem:[#allocation2 + $0x90] sm:$0xff] }
  0xd1   : > { %v451_v38 = vpop.f32.mrf.mxu0 }
  0xd2   : > { %v452_v40 = vadd.f32 %v1654_v12, %v451_v38 }
  0xd4   : > { %v465_v41 = vmax.f32 %v452_v40, 0.0 }
  0xd6   : > { %562 = vrot.lane.b32.xlu2 %v837_v29, %s1941_s16  ;;  %611 = vrot.lane.b32.xlu0 %v593_v31, %s1939_s26  ;;  %v742_v39 = vld [vmem:[#allocation2 + $0x50] sm:$0xff]  ;;  %474 = vst.msk [vmem:[#allocation2 + $0x61] sm:$0xff] %vm353_vm1, %v465_v41 }
  0xd7   : > { %513 = vrot.lane.b32.xlu1 %v788_v25, %s1427_s20  ;;  %490 = vst.msk [vmem:[#allocation3 + $0x28] sm:$0xff] %vm353_vm1, %v742_v39  ;;  %v791_v49 = vld [vmem:[#allocation2 + $0x51] sm:$0xff] }
  0xd8   : > { %v840_v52 = vld [vmem:[#allocation2 + $0x52] sm:$0xff] }
  0xd9   : > { %v454_v47 = vpop.f32.mrf.mxu0 }
  0xda   : > { %v455_v48 = vadd.f32 %v1654_v12, %v454_v47 }
  0xdc   : > { %v466_v50 = vmax.f32 %v455_v48, 0.0 }
  0xdd   : > { %v596_v44 = vld [vmem:[#allocation2 + $0x60] sm:$0xff] }
  0xde   : > { %806 = vrot.lane.b32.xlu2 %v789_v37, %s1432_s23  ;;  %515 = vrot.lane.b32.xlu0 %v789_v37, %s1427_s20  ;;  %491 = vst.msk [vmem:[#allocation3 + $0x30] sm:$0xff] %vm353_vm1, %v596_v44  ;;  %v841_v54 = vld [vmem:[#allocation2 + $0x62] sm:$0xff] }
  0xdf   : > { %757 = vrot.lane.b32.xlu1 %v593_v31, %s1433_s28  ;;  %475 = vst.msk [vmem:[#allocation2 + $0x71] sm:$0xff] %vm353_vm1, %v466_v50  ;;  %v792_v0 = vld [vmem:[#allocation2 + $0x61] sm:$0xff] }
  0xe1   : > { %v457_v56 = vpop.f32.mrf.mxu0 }
  0xe2   : > { %v458_v57 = vadd.f32 %v1654_v12, %v457_v56 }
  0xe4   : > { %v467_v58 = vmax.f32 %v458_v57, 0.0 }
  0xe6   : > { %709 = vrot.lane.b32.xlu2 %v838_v32, %s1429_s19  ;;  %759 = vrot.lane.b32.xlu0 %v741_v33, %s1433_s28  ;;  %v744_v53 = vld [vmem:[#allocation2 + $0x70] sm:$0xff]  ;;  %476 = vst.msk [vmem:[#allocation2 + $0x81] sm:$0xff] %vm353_vm1, %v467_v58 }
  0xe7   : > { %660 = vrot.lane.b32.xlu1 %v789_v37, %s1431_s27  ;;  %492 = vst.msk [vmem:[#allocation3 + $0x38] sm:$0xff] %vm353_vm1, %v744_v53  ;;  %v842_v14 = vld [vmem:[#allocation2 + $0x72] sm:$0xff] }
  0xe8   : > { %v646_v15 = vld [vmem:[#allocation2 + $0x71] sm:$0xff] }
  0xe9   : > { %v795_v37 = vld [vmem:[#allocation2 + $0x91] sm:$0xff] }
  0xed   : > { %v794_v22 = vld [vmem:[#allocation2 + $0x81] sm:$0xff] }
  0xee   : > { %857 = vrot.lane.b32.xlu2 %v839_v42, %s1434_s15  ;;  %662 = vrot.lane.b32.xlu0 %v643_v43, %s1431_s27  ;;  %v745_v27 = vld [vmem:[#allocation2 + $0x80] sm:$0xff] }
  0xef   : > { %564 = vrot.lane.b32.xlu1 %v838_v32, %s1941_s16  ;;  %v843_v28 = vld [vmem:[#allocation2 + $0x82] sm:$0xff]  ;;  %v844_v32 = vld [vmem:[#allocation2 + $0x92] sm:$0xff] }
  0xf6   : > { %613 = vrot.lane.b32.xlu2 %v741_v33, %s1939_s26  ;;  %566 = vrot.lane.b32.xlu0 %v839_v42, %s1941_s16 }
  0xf7   : > { %808 = vrot.lane.b32.xlu1 %v643_v43, %s1432_s23 }
  0xfe   : > { %517 = vrot.lane.b32.xlu2 %v643_v43, %s1427_s20  ;;  %810 = vrot.lane.b32.xlu0 %v791_v49, %s1432_s23 }
  0xff   : > { %711 = vrot.lane.b32.xlu1 %v839_v42, %s1429_s19 }
 0x106   : > { %761 = vrot.lane.b32.xlu2 %v742_v39, %s1433_s28  ;;  %713 = vrot.lane.b32.xlu0 %v840_v52, %s1429_s19 }
 0x107   : > { %859 = vrot.lane.b32.xlu1 %v840_v52, %s1434_s15 }
 0x10e   : > { %664 = vrot.lane.b32.xlu2 %v791_v49, %s1431_s27  ;;  %861 = vrot.lane.b32.xlu0 %v841_v54, %s1434_s15 }
 0x10f   : > { %615 = vrot.lane.b32.xlu1 %v742_v39, %s1939_s26 }
 0x110   : > { %v706_v55 = vpop.permute.xlu2 %705 }
 0x116   : > { %568 = vrot.lane.b32.xlu2 %v840_v52, %s1941_s16  ;;  %617 = vrot.lane.b32.xlu0 %v596_v44, %s1939_s26  ;;  %s1952_s16 = smov 12  }
 0x117   : > { %519 = vrot.lane.b32.xlu1 %v791_v49, %s1427_s20 }
 0x118   : > { %v512_v60 = vpop.permute.xlu2 %511 }
 0x119   : > { %535 = vst.msk [vmem:[#allocation3 + $0x8] sm:$0xff] %vm533_vm4, %v512_v60 }
 0x11e   : > { %812 = vrot.lane.b32.xlu2 %v792_v0, %s1432_s23  ;;  %521 = vrot.lane.b32.xlu0 %v792_v0, %s1427_s20 }
 0x11f   : > { %763 = vrot.lane.b32.xlu1 %v596_v44, %s1433_s28 }
 0x120   : > { %v756_v6 = vpop.permute.xlu2 %755 }
 0x126   : > { %715 = vrot.lane.b32.xlu2 %v841_v54, %s1429_s19  ;;  %765 = vrot.lane.b32.xlu0 %v744_v53, %s1433_s28 }
 0x127   : > { %666 = vrot.lane.b32.xlu1 %v792_v0, %s1431_s27 }
 0x128   : > { %v659_v10 = vpop.permute.xlu2 %658  ;;  %v561_v13 = vpop.permute.xlu0 %560 }
 0x129   : > { %v608_v12 = vpop.permute.xlu1 %607  ;;  %584 = vst.msk [vmem:[#allocation3 + $0x8] sm:$0xff] %vm582_vm5, %v561_v13 }
 0x12a   : > { %632 = vst.msk [vmem:[#allocation3] sm:$0xff] %vm631_vm7, %v608_v12 }
 0x12e   : > { %863 = vrot.lane.b32.xlu2 %v842_v14, %s1434_s15  ;;  %668 = vrot.lane.b32.xlu0 %v646_v15, %s1431_s27 }
 0x12f   : > { %570 = vrot.lane.b32.xlu1 %v841_v54, %s1951_s11 }
 0x130   : > { %v563_v16 = vpop.permute.xlu2 %562  ;;  %v805_v18 = vpop.permute.xlu0 %804 }
 0x131   : > { %v657_v17 = vpop.permute.xlu1 %656 }
 0x132   : > { %681 = vst.msk [vmem:[#allocation3] sm:$0xff] %vm680_vm8, %v657_v17 }
 0x133   : > { %730 = vst.msk [vmem:[#allocation3] sm:$0xff] %vm729_vm9, %v706_v55 }
 0x134   : > { %780 = vst.msk [vmem:[#allocation3] sm:$0xff] %vm779_vm10, %v756_v6 }
 0x135   : > { %829 = vst.msk [vmem:[#allocation3] sm:$0xff] %vm828_vm11, %v805_v18 }
 0x136   : > { %619 = vrot.lane.b32.xlu2 %v744_v53, %s1952_s16  ;;  %572 = vrot.lane.b32.xlu0 %v842_v14, %s1951_s11 }
 0x137   : > { %814 = vrot.lane.b32.xlu1 %v646_v15, %s1432_s23 }
 0x138   : > { %v807_v19 = vpop.permute.xlu2 %806  ;;  %v708_v21 = vpop.permute.xlu0 %707 }
 0x139   : > { %v854_v20 = vpop.permute.xlu1 %853 }
 0x13a   : > { %878 = vst.msk [vmem:[#allocation3] sm:$0xff] %vm877_vm12, %v854_v20 }
 0x13e   : > { %523 = vrot.lane.b32.xlu2 %v646_v15, %s1427_s20  ;;  %816 = vrot.lane.b32.xlu0 %v794_v22, %s1432_s23  ;;  %v981_v15 = vld [vmem:[%s1930_s5] sm:$0xf] }
 0x13f   : > { %717 = vrot.lane.b32.xlu1 %v842_v14, %s1429_s19  ;;  %1240 = vmatpush.msk.msra.mxu2 %vm928_vm6, %v981_v15 }
 0x140   : > { %v710_v23 = vpop.permute.xlu2 %709  ;;  %v856_v26 = vpop.permute.xlu0 %855 }
 0x141   : > { %v610_v24 = vpop.permute.xlu1 %609  ;;  %v886_v25 = vld [vmem:[#allocation3] sm:$0xff] }
 0x142   : > { %633 = vst.msk [vmem:[#allocation3 + $0x8] sm:$0xff] %vm631_vm7, %v610_v24  ;;  %1232 = vmatmul.msk.f32.vlgmr.msra.gmra.mxu1 %vm903_vm13, %v886_v25 }
 0x143   : > { %682 = vst.msk [vmem:[#allocation3 + $0x8] sm:$0xff] %vm680_vm8, %v659_v10 }
 0x144   : > { %731 = vst.msk [vmem:[#allocation3 + $0x8] sm:$0xff] %vm729_vm9, %v708_v21 }
 0x146   : > { %767 = vrot.lane.b32.xlu2 %v745_v27, %s1433_s28  ;;  %719 = vrot.lane.b32.xlu0 %v843_v28, %s1429_s19 }
 0x147   : > { %865 = vrot.lane.b32.xlu1 %v843_v28, %s1434_s15 }
 0x148   : > { %v858_v29 = vpop.permute.xlu2 %857  ;;  %v612_v31 = vpop.permute.xlu0 %611 }
 0x149   : > { %v514_v30 = vpop.permute.xlu1 %513 }
 0x14a   : > { %536 = vst.msk [vmem:[#allocation3 + $0x10] sm:$0xff] %vm533_vm4, %v514_v30 }
 0x14b   : > { %585 = vst.msk [vmem:[#allocation3 + $0x10] sm:$0xff] %vm582_vm5, %v563_v16  ;;  %v1054_v16 = vld [vmem:[%s1932_s7] sm:$0xff] }
 0x14c   : > { %634 = vst.msk [vmem:[#allocation3 + $0x10] sm:$0xff] %vm631_vm7, %v612_v31  ;;  %1074 = vmatpush.msra.mxu3 %v1054_v16 }
 0x14d   : > { %1249 = vmatmul.msk.f32.vlgmr.msra.gmra.mxu3 %vm394_vm0, %v1588_v1 }
 0x14e   : > { %670 = vrot.lane.b32.xlu2 %v794_v22, %s1431_s27  ;;  %867 = vrot.lane.b32.xlu0 %v844_v32, %s1434_s15  ;;  %s1138_s27 = sshll.u32 %s1871_s18, 4  ;;  %s1139_s27 = int_to_ptr.vmem [resolvable:$true] %s1138_s27 }
 0x14f   : > { %621 = vrot.lane.b32.xlu1 %v745_v27, %s1952_s16  ;;  %s1263_s16 = sshll.u32 %s1507_s13, 6 }
 0x150   : > { %v614_v33 = vpop.permute.xlu2 %613  ;;  %v516_v35 = vpop.permute.xlu0 %515  ;;  %s1137_s26 = scalar_lea.hbm %s1934_s9, %s1263_s16 }
 0x151   : > { %v758_v34 = vpop.permute.xlu1 %757  ;;  %537 = vst.msk [vmem:[#allocation3 + $0x18] sm:$0xff] %vm533_vm4, %v516_v35 }
 0x152   : > { %781 = vst.msk [vmem:[#allocation3 + $0x8] sm:$0xff] %vm779_vm10, %v758_v34 }
 0x153   : > { %830 = vst.msk [vmem:[#allocation3 + $0x8] sm:$0xff] %vm828_vm11, %v807_v19 }
 0x154   : > { %879 = vst.msk [vmem:[#allocation3 + $0x8] sm:$0xff] %vm877_vm12, %v856_v26 }
 0x155   : > { %1250 = vmatmul.msk.f32.gmra.mxu3 %vm394_vm0, %v1593_v2  ;;  %v1323_v2 = vld [vmem:[%s1929_s4] ss:$0 sm:$0xff] }
 0x156   : > { %818 = vrot.lane.b32.xlu2 %v795_v37, %s1432_s23  ;;  %s1140_s23 = sshll.u32 %s1137_s26, 4  ;;  %s1141_s23 = int_to_ptr.hbm [resolvable:$true] %s1140_s23 }
 0x157   : > { %769 = vrot.lane.b32.xlu1 %v746_v36, %s1433_s28  ;;  %s1126_s28 = scalar_lea.sflag [#allocation6], %s1572_s14  ;;  %s1370_s15 = sshra.s32 %s1141_s23, 4  ;;  %s1371_s15 = int_to_ptr.hbm [resolvable:$true] %s1370_s15 }
 0x158   : > { %v518_v38 = vpop.permute.xlu2 %517  ;;  %v760_v40 = vpop.permute.xlu0 %759  ;;  %s1372_s13 = scalar_lea.hbm %s1371_s15, 64  ;;  %p1377_p0 = scmp.lt.s32.totalorder %s1371_s15, %s1934_s9 }
 0x159   : > { %v661_v39 = vpop.permute.xlu1 %660  ;;  %538 = vst.msk [vmem:[#allocation3 + $0x20] sm:$0xff] %vm533_vm4, %v518_v38  ;;  %p1373_p6 = scmp.ne.s32.totalorder %s1371_s15, %s1372_s13  ;;  %p1378_p1 = scmp.lt.s32.totalorder %s1376_s25, %s1372_s13 }
 0x15a   : > { %683 = vst.msk [vmem:[#allocation3 + $0x10] sm:$0xff] %vm680_vm8, %v661_v39 }
 0x15b   : > { %v887_v41 = vld [vmem:[#allocation3 + $0x8] sm:$0xff]  ;;  %732 = vst.msk [vmem:[#allocation3 + $0x10] sm:$0xff] %vm729_vm9, %v710_v23  ;;  %p1374_p9 = pnand %p1373_p6, %p1536_p11  ;;  %p1379_p3 = por %p1378_p1, %p1377_p0 }
 0x15c   : > { %1233 = vmatmul.msk.f32.gmra.mxu1 %vm903_vm13, %v887_v41  ;;  %782 = vst.msk [vmem:[#allocation3 + $0x10] sm:$0xff] %vm779_vm10, %v760_v40 }
 0x15d   : > { %1251 = vmatmul.msk.f32.gmra.mxu3 %vm394_vm0, %v1598_v3  ;;  %p1375_p13 = pneg %p1374_p9 }
 0x15f   : > { %p1380_p4 = pnand %p1379_p3, %p1375_p13 }
 0x160   : > { %v762_v42 = vpop.permute.xlu2 %761  ;;  %v663_v44 = vpop.permute.xlu0 %662 }
 0x161   : > { %v565_v43 = vpop.permute.xlu1 %564 }
 0x162   : > { %586 = vst.msk [vmem:[#allocation3 + $0x18] sm:$0xff] %vm582_vm5, %v565_v43 }
 0x163   : > { %635 = vst.msk [vmem:[#allocation3 + $0x18] sm:$0xff] %vm631_vm7, %v614_v33 }
 0x164   : > { %684 = vst.msk [vmem:[#allocation3 + $0x18] sm:$0xff] %vm680_vm8, %v663_v44 }
 0x165   : > { %1252 = vmatmul.msk.f32.gmra.mxu3 %vm394_vm0, %v1606_v5 }
 0x168   : > { %v665_v45 = vpop.permute.xlu2 %664  ;;  %v567_v47 = vpop.permute.xlu0 %566 }
 0x169   : > { %v809_v46 = vpop.permute.xlu1 %808  ;;  %587 = vst.msk [vmem:[#allocation3 + $0x20] sm:$0xff] %vm582_vm5, %v567_v47 }
 0x16a   : > { %831 = vst.msk [vmem:[#allocation3 + $0x10] sm:$0xff] %vm828_vm11, %v809_v46  ;;  %v1325_v46 = vld [vmem:[%s1933_s8] ss:$0 sm:$0xff] }
 0x16b   : > { %880 = vst.msk [vmem:[#allocation3 + $0x10] sm:$0xff] %vm877_vm12, %v858_v29 }
 0x16d   : > { %1253 = vmatmul.msk.f32.gmra.mxu3 %vm394_vm0, %v1619_v7 }
 0x170   : > { %v569_v48 = vpop.permute.xlu2 %568  ;;  %v811_v50 = vpop.permute.xlu0 %810 }
 0x171   : > { %v712_v49 = vpop.permute.xlu1 %711 }
 0x172   : > { %733 = vst.msk [vmem:[#allocation3 + $0x18] sm:$0xff] %vm729_vm9, %v712_v49  ;;  %v888_v51 = vld [vmem:[#allocation3 + $0x10] sm:$0xff] }
 0x173   : > { %783 = vst.msk [vmem:[#allocation3 + $0x18] sm:$0xff] %vm779_vm10, %v762_v42  ;;  %1234 = vmatmul.msk.f32.gmra.mxu1 %vm903_vm13, %v888_v51 }
 0x174   : > { %832 = vst.msk [vmem:[#allocation3 + $0x18] sm:$0xff] %vm828_vm11, %v811_v50 }
 0x175   : > { %1254 = vmatmul.msk.f32.gmra.mxu3 %vm394_vm0, %v1632_v8 }
 0x178   : > { %v813_v52 = vpop.permute.xlu2 %812  ;;  %v714_v54 = vpop.permute.xlu0 %713 }
 0x179   : > { %v860_v53 = vpop.permute.xlu1 %859 }
 0x17a   : > { %881 = vst.msk [vmem:[#allocation3 + $0x18] sm:$0xff] %vm877_vm12, %v860_v53 }
 0x17d   : > { %1255 = vmatmul.msk.f32.gmra.mxu3 %vm394_vm0, %v1641_v9 }
 0x180   : > { %v716_v55 = vpop.permute.xlu2 %715  ;;  %v862_v58 = vpop.permute.xlu0 %861 }
 0x181   : > { %v616_v56 = vpop.permute.xlu1 %615  ;;  %v889_v57 = vld [vmem:[#allocation3 + $0x18] sm:$0xff] }
 0x182   : > { %636 = vst.msk [vmem:[#allocation3 + $0x20] sm:$0xff] %vm631_vm7, %v616_v56  ;;  %1235 = vmatmul.msk.f32.gmra.mxu1 %vm903_vm13, %v889_v57 }
 0x183   : > { %685 = vst.msk [vmem:[#allocation3 + $0x20] sm:$0xff] %vm680_vm8, %v665_v45 }
 0x184   : > { %734 = vst.msk [vmem:[#allocation3 + $0x20] sm:$0xff] %vm729_vm9, %v714_v54 }
 0x185   : > { %1256 = vmatmul.msk.f32.gmra.mxu3 %vm394_vm0, %v1647_v11 }
 0x188   : > { %v864_v59 = vpop.permute.xlu2 %863  ;;  %v618_v61 = vpop.permute.xlu0 %617 }
 0x189   : > { %v520_v60 = vpop.permute.xlu1 %519 }
 0x18a   : > { %539 = vst.msk [vmem:[#allocation3 + $0x28] sm:$0xff] %vm533_vm4, %v520_v60 }
 0x18b   : > { %588 = vst.msk [vmem:[#allocation3 + $0x28] sm:$0xff] %vm582_vm5, %v569_v48  ;;  %v1324_v48 = vld [vmem:[%s1931_s6] ss:$0 sm:$0xff] }
 0x18c   : > { %637 = vst.msk [vmem:[#allocation3 + $0x28] sm:$0xff] %vm631_vm7, %v618_v61 }
 0x190   : > { %v620_v62 = vpop.permute.xlu2 %619  ;;  %v522_v0 = vpop.permute.xlu0 %521 }
 0x191   : > { %v764_v63 = vpop.permute.xlu1 %763  ;;  %540 = vst.msk [vmem:[#allocation3 + $0x30] sm:$0xff] %vm533_vm4, %v522_v0 }
 0x192   : > { %784 = vst.msk [vmem:[#allocation3 + $0x20] sm:$0xff] %vm779_vm10, %v764_v63 }
 0x193   : > { %833 = vst.msk [vmem:[#allocation3 + $0x20] sm:$0xff] %vm828_vm11, %v813_v52 }
 0x194   : > { %882 = vst.msk [vmem:[#allocation3 + $0x20] sm:$0xff] %vm877_vm12, %v862_v58 }
 0x198   : > { %v524_v4 = vpop.permute.xlu2 %523  ;;  %v766_v10 = vpop.permute.xlu0 %765 }
 0x199   : > { %v667_v6 = vpop.permute.xlu1 %666  ;;  %541 = vst.msk [vmem:[#allocation3 + $0x38] sm:$0xff] %vm533_vm4, %v524_v4 }
 0x19a   : > { %686 = vst.msk [vmem:[#allocation3 + $0x28] sm:$0xff] %vm680_vm8, %v667_v6 }
 0x19b   : > { %v890_v12 = vld [vmem:[#allocation3 + $0x20] sm:$0xff]  ;;  %735 = vst.msk [vmem:[#allocation3 + $0x28] sm:$0xff] %vm729_vm9, %v716_v55 }
 0x19c   : > { %1236 = vmatmul.msk.f32.gmra.mxu1 %vm903_vm13, %v890_v12  ;;  %785 = vst.msk [vmem:[#allocation3 + $0x28] sm:$0xff] %vm779_vm10, %v766_v10 }
 0x1a0   : > { %v669_v14 = vpop.permute.xlu0 %668  ;;  %v768_v20 = vpop.permute.xlu2 %767 }
 0x1a1   : > { %v571_v13 = vpop.permute.xlu1 %570 }
 0x1a2   : > { %589 = vst.msk [vmem:[#allocation3 + $0x30] sm:$0xff] %vm582_vm5, %v571_v13 }
 0x1a3   : > { %638 = vst.msk [vmem:[#allocation3 + $0x30] sm:$0xff] %vm631_vm7, %v620_v62 }
 0x1a4   : > { %687 = vst.msk [vmem:[#allocation3 + $0x30] sm:$0xff] %vm680_vm8, %v669_v14 }
 0x1a8   : > { %v573_v18 = vpop.permute.xlu0 %572  ;;  %v671_v24 = vpop.permute.xlu2 %670 }
 0x1a9   : > { %v815_v17 = vpop.permute.xlu1 %814  ;;  %590 = vst.msk [vmem:[#allocation3 + $0x38] sm:$0xff] %vm582_vm5, %v573_v18 }
 0x1aa   : > { %834 = vst.msk [vmem:[#allocation3 + $0x28] sm:$0xff] %vm828_vm11, %v815_v17 }
 0x1ab   : > { %883 = vst.msk [vmem:[#allocation3 + $0x28] sm:$0xff] %vm877_vm12, %v864_v59 }
 0x1b0   : > { %v817_v22 = vpop.permute.xlu0 %816  ;;  %v819_v3 = vpop.permute.xlu2 %818 }
 0x1b1   : > { %v718_v19 = vpop.permute.xlu1 %717 }
 0x1b2   : > { %736 = vst.msk [vmem:[#allocation3 + $0x30] sm:$0xff] %vm729_vm9, %v718_v19  ;;  %v891_v21 = vld [vmem:[#allocation3 + $0x28] sm:$0xff] }
 0x1b3   : > { %786 = vst.msk [vmem:[#allocation3 + $0x30] sm:$0xff] %vm779_vm10, %v768_v20  ;;  %1237 = vmatmul.msk.f32.gmra.mxu1 %vm903_vm13, %v891_v21 }
 0x1b4   : > { %835 = vst.msk [vmem:[#allocation3 + $0x30] sm:$0xff] %vm828_vm11, %v817_v22 }
 0x1b8   : > { %v720_v26 = vpop.permute.xlu0 %719 }
 0x1b9   : > { %v866_v1 = vpop.permute.xlu1 %865 }
 0x1ba   : > { %884 = vst.msk [vmem:[#allocation3 + $0x30] sm:$0xff] %vm877_vm12, %v866_v1 }
 0x1bf   : > { %v949_v23 = vpop.f32.mrf.mxu1 }
 0x1c0   : > { %v950_v25 = vadd.f32 %v1323_v2, %v949_v23  ;;  %v868_v30 = vpop.permute.xlu0 %867 }
 0x1c1   : > { %v622_v27 = vpop.permute.xlu1 %621  ;;  %v892_v28 = vld [vmem:[#allocation3 + $0x30] sm:$0xff] }
 0x1c2   : > { %v973_v29 = vmax.f32 %v950_v25, 0.0  ;;  %639 = vst.msk [vmem:[#allocation3 + $0x38] sm:$0xff] %vm631_vm7, %v622_v27  ;;  %1238 = vmatmul.msk.f32.gmra.mxu1 %vm903_vm13, %v892_v28 }
 0x1c3   : > { %688 = vst.msk [vmem:[#allocation3 + $0x38] sm:$0xff] %vm680_vm8, %v671_v24 }
 0x1c4   : > { %737 = vst.msk [vmem:[#allocation3 + $0x38] sm:$0xff] %vm729_vm9, %v720_v26  ;;  %1241 = vmatmul.msk.f32.vlgmr.msra.gmra.mxu2 %vm353_vm1, %v973_v29 }
 0x1c9   : > { %v770_v5 = vpop.permute.xlu1 %769 }
 0x1ca   : > { %787 = vst.msk [vmem:[#allocation3 + $0x38] sm:$0xff] %vm779_vm10, %v770_v5 }
 0x1cb   : > { %836 = vst.msk [vmem:[#allocation3 + $0x38] sm:$0xff] %vm828_vm11, %v819_v3 }
 0x1cc   : > { %885 = vst.msk [vmem:[#allocation3 + $0x38] sm:$0xff] %vm877_vm12, %v868_v30 }
 0x1d0   : > { %v1076_v47 = vpop.f32.mrf.mxu3 }
 0x1d1   : > { %v1077_v49 = vadd.f32 %v1325_v46, %v1076_v47 }
 0x1d3   : > { %v893_v31 = vld [vmem:[#allocation3 + $0x38] sm:$0xff] }
 0x1d4   : > { %1239 = vmatmul.msk.f32.gmra.mxu1 %vm903_vm13, %v893_v31 }
 0x1d8   : > { %v1079_v57 = vpop.f32.mrf.mxu3 }
 0x1d9   : > { %v952_v32 = vpop.f32.mrf.mxu1  ;;  %v1080_v58 = vadd.f32 %v1325_v46, %v1079_v57 }
 0x1da   : > { %v953_v7 = vadd.f32 %v1323_v2, %v952_v32 }
 0x1dc   : > { %v974_v33 = vmax.f32 %v953_v7, 0.0 }
 0x1de   : > { %1242 = vmatmul.msk.f32.gmra.mxu2 %vm353_vm1, %v974_v33 }
 0x1e0   : > { %v1082_v63 = vpop.f32.mrf.mxu3 }
 0x1e1   : > { %v1083_v0 = vadd.f32 %v1325_v46, %v1082_v63 }
 0x1e8   : > { %v1085_v13 = vpop.f32.mrf.mxu3 }
 0x1e9   : > { %v1086_v14 = vadd.f32 %v1325_v46, %v1085_v13 }
 0x1f0   : > { %v955_v34 = vpop.f32.mrf.mxu1  ;;  %v1088_v19 = vpop.f32.mrf.mxu3 }
 0x1f1   : > { %v956_v35 = vadd.f32 %v1323_v2, %v955_v34  ;;  %v1089_v20 = vadd.f32 %v1325_v46, %v1088_v19 }
 0x1f3   : > { %v975_v36 = vmax.f32 %v956_v35, 0.0 }
 0x1f5   : > { %1243 = vmatmul.msk.f32.gmra.mxu2 %vm353_vm1, %v975_v36 }
 0x1f8   : > { %v1091_v23 = vpop.f32.mrf.mxu3 }
 0x1f9   : > { %v1092_v24 = vadd.f32 %v1325_v46, %v1091_v23 }
 0x1ff   : > { %v958_v8 = vpop.f32.mrf.mxu1 }
 0x200   : > { %v959_v37 = vadd.f32 %v1323_v2, %v958_v8  ;;  %v1094_v29 = vpop.f32.mrf.mxu3 }
 0x201   : > { %v1095_v3 = vadd.f32 %v1325_v46, %v1094_v29 }
 0x202   : > { %v976_v38 = vmax.f32 %v959_v37, 0.0 }
 0x204   : > { %1244 = vmatmul.msk.f32.gmra.mxu2 %vm353_vm1, %v976_v38 }
 0x208   : > { %v1097_v7 = vpop.f32.mrf.mxu3 }
 0x209   : > { %v1098_v33 = vadd.f32 %v1325_v46, %v1097_v7 }
 0x219   : > { %v961_v39 = vpop.f32.mrf.mxu1 }
 0x21a   : > { %v962_v9 = vadd.f32 %v1323_v2, %v961_v39 }
 0x21c   : > { %v977_v40 = vmax.f32 %v962_v9, 0.0 }
 0x21e   : > { %1245 = vmatmul.msk.f32.gmra.mxu2 %vm353_vm1, %v977_v40 }
 0x230   : > { %v964_v41 = vpop.f32.mrf.mxu1 }
 0x231   : > { %v965_v42 = vadd.f32 %v1323_v2, %v964_v41 }
 0x233   : > { %v978_v43 = vmax.f32 %v965_v42, 0.0 }
 0x235   : > { %1246 = vmatmul.msk.f32.gmra.mxu2 %vm353_vm1, %v978_v43 }
 0x23f   : > { %v967_v11 = vpop.f32.mrf.mxu1 }
 0x240   : > { %v968_v44 = vadd.f32 %v1323_v2, %v967_v11 }
 0x242   : > { %v979_v45 = vmax.f32 %v968_v44, 0.0 }
 0x244   : > { %1247 = vmatmul.msk.f32.gmra.mxu2 %vm353_vm1, %v979_v45 }
 0x247   : > { %v1030_v50 = vpop.f32.mrf.mxu2 }
 0x248   : > { %v1031_v51 = vadd.f32 %v1324_v48, %v1030_v50 }
 0x24a   : > { %v1100_v52 = vadd.f32 %v1077_v49, %v1031_v51 }
 0x24c   : > { %v1108_v53 = vmax.f32 %v1100_v52, 0.0 }
 0x24e   : > { %1117 = vst.msk [vmem:[%s1871_s18] sm:$0xff] %vm1116_vm14, %v1108_v53 }
 0x251   : > { %v970_v54 = vpop.f32.mrf.mxu1 }
 0x252   : > { %v971_v55 = vadd.f32 %v1323_v2, %v970_v54 }
 0x254   : > { %v980_v56 = vmax.f32 %v971_v55, 0.0 }
 0x256   : > { %1248 = vmatmul.msk.f32.gmra.mxu2 %vm353_vm1, %v980_v56 }
 0x261   : > { %v1033_v59 = vpop.f32.mrf.mxu2 }
 0x262   : > { %v1034_v60 = vadd.f32 %v1324_v48, %v1033_v59 }
 0x264   : > { %v1101_v61 = vadd.f32 %v1080_v58, %v1034_v60 }
 0x266   : > { %v1109_v62 = vmax.f32 %v1101_v61, 0.0 }
 0x268   : > { %1118 = vst.msk [vmem:[%s1871_s18 + $0x8] sm:$0xff] %vm1116_vm14, %v1109_v62 }
 0x278   : > { %v1036_v4 = vpop.f32.mrf.mxu2 }
 0x279   : > { %v1037_v6 = vadd.f32 %v1324_v48, %v1036_v4 }
 0x27b   : > { %v1102_v10 = vadd.f32 %v1083_v0, %v1037_v6 }
 0x27d   : > { %v1110_v12 = vmax.f32 %v1102_v10, 0.0 }
 0x27f   : > { %1119 = vst.msk [vmem:[%s1871_s18 + $0x10] sm:$0xff] %vm1116_vm14, %v1110_v12 }
 0x287   : > { %v1039_v15 = vpop.f32.mrf.mxu2 }
 0x288   : > { %v1040_v16 = vadd.f32 %v1324_v48, %v1039_v15 }
 0x28a   : > { %v1103_v17 = vadd.f32 %v1086_v14, %v1040_v16 }
 0x28c   : > { %v1111_v18 = vmax.f32 %v1103_v17, 0.0 }
 0x28e   : > { %1120 = vst.msk [vmem:[%s1871_s18 + $0x18] sm:$0xff] %vm1116_vm14, %v1111_v18 }
 0x2a1   : > { %v1042_v21 = vpop.f32.mrf.mxu2 }
 0x2a2   : > { %v1043_v22 = vadd.f32 %v1324_v48, %v1042_v21 }
 0x2a4   : > { %v1104_v1 = vadd.f32 %v1089_v20, %v1043_v22 }
 0x2a6   : > { %v1112_v2 = vmax.f32 %v1104_v1, 0.0 }
 0x2a8   : > { %1121 = vst.msk [vmem:[%s1871_s18 + $0x20] sm:$0xff] %vm1116_vm14, %v1112_v2 }
 0x2b8   : > { %v1045_v25 = vpop.f32.mrf.mxu2 }
 0x2b9   : > { %v1046_v26 = vadd.f32 %v1324_v48, %v1045_v25 }
 0x2bb   : > { %v1105_v27 = vadd.f32 %v1092_v24, %v1046_v26 }
 0x2bd   : > { %v1113_v28 = vmax.f32 %v1105_v27, 0.0 }
 0x2bf   : > { %1122 = vst.msk [vmem:[%s1871_s18 + $0x28] sm:$0xff] %vm1116_vm14, %v1113_v28 }
 0x2c7   : > { %v1048_v5 = vpop.f32.mrf.mxu2 }
 0x2c8   : > { %v1049_v30 = vadd.f32 %v1324_v48, %v1048_v5 }
 0x2ca   : > { %v1106_v31 = vadd.f32 %v1095_v3, %v1049_v30 }
 0x2cc   : > { %v1114_v32 = vmax.f32 %v1106_v31, 0.0 }
 0x2ce   : > { %1123 = vst.msk [vmem:[%s1871_s18 + $0x30] sm:$0xff] %vm1116_vm14, %v1114_v32 }
 0x2d9   : > { %v1051_v34 = vpop.f32.mrf.mxu2 }
 0x2da   : > { %v1052_v35 = vadd.f32 %v1324_v48, %v1051_v34 }
 0x2dc   : > { %v1107_v36 = vadd.f32 %v1098_v33, %v1052_v35 }
 0x2de   : > { %v1115_v8 = vmax.f32 %v1107_v36, 0.0 }
 0x2e0   : > { %1124 = vst.msk [vmem:[%s1871_s18 + $0x38] sm:$0xff] %vm1116_vm14, %v1115_v8 }
 0x2e1   : > { %1383 = shalt.err (!%p1380_p4)
}
 0x2e2   : > { %s1435_s14 = smov 128  }
 0x2e3   : > { %1266 = dma.vmem_to_hbm [thread:$0]  (%p1536_p11), %s1139_s27, 1024, %s1141_s23, %s1126_s28, %s1435_s14, %s1435_s14, %s1951_s11  }
 0x2e4 PF: > { %s1155_s18 = sand.u32 1, %s1410_s30   ;;  %p1954_p7 = scmp.ge.s32.totalorder %s1422_s12, 2 }
 0x2e5   : > { %s1156_s20 = scalar_lea.sflag [#allocation6], %s1155_s18 }
 0x2e6   : > { %p1273_p5 = pnand %p1954_p7, %p1540_p12 }
 0x2e8   : > { %p1274_p8 = pneg %p1273_p5 }
 0x2ea   : > { %1405 = dma.done.wait (%p1274_p8), %s1156_s20, 1024  }
 0x2eb   : > { %1407 = vsyncadd (%p1274_p8), %s1156_s20, 4294966272  ;;  %s1955_s12 = sld [smem:[#allocation11_spill]]  ;;  %s1958_s30 = smov %s1414_s10 }
 0x2ec   : > { %s1956_s19 = sld [smem:[#allocation10_spill]] }
 0x2ed   : > { %s1957_s11 = sld [smem:[#allocation12_spill]] }
 0x2f1   : > { %p22_p10 = scmp.ge.s32.totalorder %s1955_s12, 4  }
 0x2f2   : > { %s1959_s10 = smov %s1956_s19 }
 0x2f3   :  { %24 = sbr.rel (!%p22_p10) target bundleno = 5 (0x5), region = 104 }
 0x2f8   :  { %1162 = vsyncpa [#allocation5], 1 }
 0x2f9   :  { %1164 = vsyncpa [#allocation5 + $0x1], 1 }
 0x2fa   :  { %1165 = vsyncpa [#allocation6], 1 }
 0x2fb   :  { %1167 = vsyncpa [#allocation6 + $0x1], 1 }

</bundles_post_ra>
